<compile_context>
chip_gen: v7x
topology: tpu7x:2x2x1
jax: 0.10.0
libtpu: 0.0.40
codegen_flags: <defaults>
</compile_context>

<pallas_src>
import jax
import jax.numpy as jnp
from jax.experimental import pallas as pl
from jax.experimental.pallas import tpu as pltpu


def _sdpa_kernel(scale_ref, q_ref, k_ref, v_ref, m_ref, out_ref, attn_ref):
    """One query tile, all N = B*H heads at once.

    q_ref : [N, QT, Dk]      m_ref   : [N, QT, S]
    k_ref : [N, Dk, S]       out_ref : [QT, N*Dv]   (heads packed along lanes)
    v_ref : [N, S, Dv]       attn_ref: [QT, N*S]    (heads packed along lanes)
    """
    n = q_ref.shape[0]
    scale = scale_ref[0]

    # Fold the scalar scale into q (a [QT, Dk] multiply) instead of the
    # [QT, S] scores: mathematically identical, one fewer full-size VPU pass.
    q = q_ref[...].astype(jnp.float32) * scale
    k = k_ref[...].astype(jnp.float32)
    v = v_ref[...].astype(jnp.float32)
    m = m_ref[...].astype(jnp.float32)

    # scores = (q * scale) @ k * mask_global
    # single batched contraction over all B*H heads (one dot_general w/ batch dim)
    scores = jnp.einsum("nqd,nds->nqs", q, k,
                        preferred_element_type=jnp.float32)
    scores = scores * m

    # numerically-stable softmax over the seq_len axis
    smax = jnp.max(scores, axis=-1, keepdims=True)
    e = jnp.exp(scores - smax)
    denom = jnp.sum(e, axis=-1, keepdims=True)
    # reciprocal runs on the EUP; exact mode (approx=True would relax the 1e-5 check)
    attn = e * pl.reciprocal(denom)

    out = jnp.einsum("nqs,nsd->nqd", attn, v,
                     preferred_element_type=jnp.float32)

    # Lane-dense writeback: pack heads along the last (128-lane) axis so the
    # stores are (near) full-width instead of 8/128- or 16/128-masked stores.
    attn_ref[...] = jnp.concatenate(
        [attn[i] for i in range(n)], axis=-1).astype(attn_ref.dtype)
    out_ref[...] = jnp.concatenate(
        [out[i] for i in range(n)], axis=-1).astype(out_ref.dtype)


def scaled_dot_product_attention(q, k, v, mask_global, scale, *, q_tile=None):
    """q:[B,H,Q,Dk]  k:[B,H,Dk,S]  v:[B,H,S,Dv]  mask_global:[B,H,Q,S].

    Returns (output [B,H,Q,Dv], attn [B,H,Q,S]) -- module with res_attention=False.
    """
    B, H, Q, Dk = q.shape
    S = k.shape[-1]
    Dv = v.shape[-1]
    N = B * H

    # >= 2 "parallel" grid steps keep both v7x TensorCores busy; the query tile
    # must stay aligned to the 8-sublane tiling.
    if q_tile is None:
        q_tile = Q // 2 if (Q % 16 == 0) else Q
    assert Q % q_tile == 0 and (q_tile % 8 == 0 or q_tile == Q)
    grid = (Q // q_tile,)

    # Collapse (B, H) into one leading axis; every head is handled per step.
    qf = q.reshape(N, Q, Dk)
    kf = k.reshape(N, Dk, S)
    vf = v.reshape(N, S, Dv)
    mf = mask_global.reshape(N, Q, S)
    scale_arr = jnp.asarray([scale], dtype=jnp.float32)

    grid_spec = pl.GridSpec(
        grid=grid,
        in_specs=[
            pl.BlockSpec(memory_space=pltpu.MemorySpace.SMEM),      # scale (SMEM scalar)
            pl.BlockSpec((N, q_tile, Dk), lambda i: (0, i, 0)),     # q
            pl.BlockSpec((N, Dk, S), lambda i: (0, 0, 0)),          # k (resident, not re-fetched)
            pl.BlockSpec((N, S, Dv), lambda i: (0, 0, 0)),          # v (resident, not re-fetched)
            pl.BlockSpec((N, q_tile, S), lambda i: (0, i, 0)),      # mask_global
        ],
        out_specs=(
            pl.BlockSpec((q_tile, N * Dv), lambda i: (i, 0)),       # out  (lane-dense)
            pl.BlockSpec((q_tile, N * S), lambda i: (i, 0)),        # attn (lane-dense)
        ),
    )

    out_shapes = (
        jax.ShapeDtypeStruct((Q, N * Dv), jnp.float32),
        jax.ShapeDtypeStruct((Q, N * S), jnp.float32),
    )

    flops = 2 * N * Q * S * (Dk + Dv)
    bytes_accessed = 4 * (qf.size + kf.size + vf.size + mf.size
                          + Q * N * Dv + Q * N * S)
    cost = pl.CostEstimate(flops=flops,
                           transcendentals=N * Q * S,
                           bytes_accessed=bytes_accessed)

    out_flat, attn_flat = pl.pallas_call(
        _sdpa_kernel,
        out_shape=out_shapes,
        grid_spec=grid_spec,
        compiler_params=pltpu.CompilerParams(
            dimension_semantics=("parallel",)),
        cost_estimate=cost,
    )(scale_arr, qf, kf, vf, mf)

    # Layout plumbing back to the module's [B, H, Q, *] convention (column
    # index of the flat outputs is n*S + s with n = b*H + h).
    out = out_flat.reshape(Q, B, H, Dv).transpose(1, 2, 0, 3)
    attn = attn_flat.reshape(Q, B, H, S).transpose(1, 2, 0, 3)
    # TODO(synk): when the caller never consumes attn (res_attention=False,
    # store_attn=False), this second output can be dropped or emitted in bf16
    # to halve the writeback traffic.
    return out, attn


if __name__ == "__main__":
    # Module config: d_model=32, n_heads=4 -> head_dim = d_k = d_v = 8
    d_model, n_heads = 32, 4
    head_dim = d_model // n_heads
    bs, q_len, seq_len = 2, 16, 16

    # lsa=False -> scale is the fixed constant head_dim ** -0.5
    scale = float(head_dim) ** (-0.5)

    key = jax.random.PRNGKey(0)
    kq, kk, kv, km = jax.random.split(key, 4)
    q = jax.random.normal(kq, (bs, n_heads, q_len, head_dim), dtype=jnp.float32)
    k = jax.random.normal(kk, (bs, n_heads, head_dim, seq_len), dtype=jnp.float32)
    v = jax.random.normal(kv, (bs, n_heads, seq_len, head_dim), dtype=jnp.float32)
    # mask_global: multiplicative global attention weighting (positive weights,
    # as produced by softmax(w_s) @ upper-triangular ones in the encoder)
    mask_global = jax.random.uniform(km, (bs, n_heads, q_len, seq_len),
                                     dtype=jnp.float32)

    out, attn = scaled_dot_product_attention(q, k, v, mask_global, scale)
    out, attn = jax.block_until_ready(out), jax.block_until_ready(attn)

    # Pure-JAX reference.  scale commutes through the matmul; it is factored
    # onto q exactly as in the kernel so the comparison stays at f32 tolerance
    # irrespective of the backend's default matmul operand precision.
    scores_ref = jnp.einsum("bhqd,bhds->bhqs", q * scale, k) * mask_global
    attn_ref = jax.nn.softmax(scores_ref, axis=-1)
    out_ref = jnp.einsum("bhqs,bhsd->bhqd", attn_ref, v)

    assert out.shape == (bs, n_heads, q_len, head_dim)
    assert attn.shape == (bs, n_heads, q_len, seq_len)
    assert jnp.allclose(attn, attn_ref, atol=1e-5, rtol=1e-5)
    assert jnp.allclose(out, out_ref, atol=1e-5, rtol=1e-5)

    print("KERNEL_OK")
</pallas_src>

<mosaic_0001>
module attributes {stable_mosaic.version = 11 : i64} {
  func.func @_sdpa_kernel(%arg0: i32, %arg1: memref<1xf32, #tpu.memory_space<smem>>, %arg2: memref<8x8x8xf32, #tpu.memory_space<vmem>>, %arg3: memref<8x8x16xf32, #tpu.memory_space<vmem>>, %arg4: memref<8x16x8xf32, #tpu.memory_space<vmem>>, %arg5: memref<8x8x16xf32, #tpu.memory_space<vmem>>, %arg6: memref<8x64xf32, #tpu.memory_space<vmem>>, %arg7: memref<8x128xf32, #tpu.memory_space<vmem>>) attributes {dimension_semantics = [#tpu.dimension_semantics<parallel>], iteration_bounds = array<i64: 2>, scalar_prefetch = 0 : i64, scratch_operands = 0 : i64, tpu.core_type = #tpu.core_type<tc>, window_params = [{transform_indices = @transform_0, window_bounds = array<i64: 1>}, {transform_indices = @transform_1, window_bounds = array<i64: 8, 8, 8>}, {pipeline_mode = #tpu.pipeline_mode<synchronous>, transform_indices = @transform_2, window_bounds = array<i64: 8, 8, 16>}, {pipeline_mode = #tpu.pipeline_mode<synchronous>, transform_indices = @transform_3, window_bounds = array<i64: 8, 16, 8>}, {transform_indices = @transform_4, window_bounds = array<i64: 8, 8, 16>}, {transform_indices = @transform_5, window_bounds = array<i64: 8, 64>}, {transform_indices = @transform_6, window_bounds = array<i64: 8, 128>}]} {
    %c0 = arith.constant 0 : index
    %0 = memref.load %arg1[%c0] : memref<1xf32, #tpu.memory_space<smem>>
    %c0_0 = arith.constant 0 : index
    %c0_1 = arith.constant 0 : index
    %c0_2 = arith.constant 0 : index
    %1 = vector.load %arg2[%c0_0, %c0_1, %c0_2] : memref<8x8x8xf32, #tpu.memory_space<vmem>>, vector<8x8x8xf32>
    %2 = vector.broadcast %0 : f32 to vector<8x8x8xf32>
    %3 = arith.mulf %1, %2 : vector<8x8x8xf32>
    %c0_3 = arith.constant 0 : index
    %c0_4 = arith.constant 0 : index
    %c0_5 = arith.constant 0 : index
    %4 = vector.load %arg3[%c0_3, %c0_4, %c0_5] : memref<8x8x16xf32, #tpu.memory_space<vmem>>, vector<8x8x16xf32>
    %c0_6 = arith.constant 0 : index
    %c0_7 = arith.constant 0 : index
    %c0_8 = arith.constant 0 : index
    %5 = vector.load %arg4[%c0_6, %c0_7, %c0_8] : memref<8x16x8xf32, #tpu.memory_space<vmem>>, vector<8x16x8xf32>
    %c0_9 = arith.constant 0 : index
    %c0_10 = arith.constant 0 : index
    %c0_11 = arith.constant 0 : index
    %6 = vector.load %arg5[%c0_9, %c0_10, %c0_11] : memref<8x8x16xf32, #tpu.memory_space<vmem>>, vector<8x8x16xf32>
    "tpu.trace_start"() <{level = 10 : i32, message = "nqd,nds->nqs"}> : () -> ()
    %cst = arith.constant dense<0.000000e+00> : vector<8x8x16xf32>
    %7 = tpu.matmul %3, %4, %cst {dimension_numbers = #tpu.dot_dimension_numbers<[2], [1], [1], [2], [0, 0, 0, 1, 1, 2], [0], [0]>} : vector<8x8x8xf32>, vector<8x8x16xf32>, vector<8x8x16xf32> -> vector<8x8x16xf32>
    "tpu.trace_stop"() : () -> ()
    %8 = arith.mulf %7, %6 : vector<8x8x16xf32>
    %cst_12 = arith.constant dense<0xFF800000> : vector<8x8xf32>
    %9 = vector.multi_reduction <maximumf>, %8, %cst_12 [2] : vector<8x8x16xf32> to vector<8x8xf32>
    %10 = vector.shape_cast %9 : vector<8x8xf32> to vector<8x8x1xf32>
    %11 = vector.broadcast %10 : vector<8x8x1xf32> to vector<8x8x16xf32>
    %12 = arith.subf %8, %11 : vector<8x8x16xf32>
    %13 = math.exp %12 : vector<8x8x16xf32>
    %cst_13 = arith.constant dense<0.000000e+00> : vector<8x8xf32>
    %14 = vector.multi_reduction <add>, %13, %cst_13 [2] : vector<8x8x16xf32> to vector<8x8xf32>
    %15 = vector.shape_cast %14 : vector<8x8xf32> to vector<8x8x1xf32>
    %16 = tpu.reciprocal %15 : vector<8x8x1xf32> -> vector<8x8x1xf32>
    %17 = vector.broadcast %16 : vector<8x8x1xf32> to vector<8x8x16xf32>
    %18 = arith.mulf %13, %17 : vector<8x8x16xf32>
    "tpu.trace_start"() <{level = 10 : i32, message = "nqs,nsd->nqd"}> : () -> ()
    %cst_14 = arith.constant dense<0.000000e+00> : vector<8x8x8xf32>
    %19 = tpu.matmul %18, %5, %cst_14 {dimension_numbers = #tpu.dot_dimension_numbers<[2], [1], [1], [2], [0, 0, 0, 1, 1, 2], [0], [0]>} : vector<8x8x16xf32>, vector<8x16x8xf32>, vector<8x8x8xf32> -> vector<8x8x8xf32>
    "tpu.trace_stop"() : () -> ()
    %20 = vector.extract_strided_slice %18 {offsets = [0, 0, 0], sizes = [1, 8, 16], strides = [1, 1, 1]} : vector<8x8x16xf32> to vector<1x8x16xf32>
    %21 = vector.shape_cast %20 : vector<1x8x16xf32> to vector<8x16xf32>
    %22 = vector.extract_strided_slice %18 {offsets = [1, 0, 0], sizes = [1, 8, 16], strides = [1, 1, 1]} : vector<8x8x16xf32> to vector<1x8x16xf32>
    %23 = vector.shape_cast %22 : vector<1x8x16xf32> to vector<8x16xf32>
    %24 = vector.extract_strided_slice %18 {offsets = [2, 0, 0], sizes = [1, 8, 16], strides = [1, 1, 1]} : vector<8x8x16xf32> to vector<1x8x16xf32>
    %25 = vector.shape_cast %24 : vector<1x8x16xf32> to vector<8x16xf32>
    %26 = vector.extract_strided_slice %18 {offsets = [3, 0, 0], sizes = [1, 8, 16], strides = [1, 1, 1]} : vector<8x8x16xf32> to vector<1x8x16xf32>
    %27 = vector.shape_cast %26 : vector<1x8x16xf32> to vector<8x16xf32>
    %28 = vector.extract_strided_slice %18 {offsets = [4, 0, 0], sizes = [1, 8, 16], strides = [1, 1, 1]} : vector<8x8x16xf32> to vector<1x8x16xf32>
    %29 = vector.shape_cast %28 : vector<1x8x16xf32> to vector<8x16xf32>
    %30 = vector.extract_strided_slice %18 {offsets = [5, 0, 0], sizes = [1, 8, 16], strides = [1, 1, 1]} : vector<8x8x16xf32> to vector<1x8x16xf32>
    %31 = vector.shape_cast %30 : vector<1x8x16xf32> to vector<8x16xf32>
    %32 = vector.extract_strided_slice %18 {offsets = [6, 0, 0], sizes = [1, 8, 16], strides = [1, 1, 1]} : vector<8x8x16xf32> to vector<1x8x16xf32>
    %33 = vector.shape_cast %32 : vector<1x8x16xf32> to vector<8x16xf32>
    %34 = vector.extract_strided_slice %18 {offsets = [7, 0, 0], sizes = [1, 8, 16], strides = [1, 1, 1]} : vector<8x8x16xf32> to vector<1x8x16xf32>
    %35 = vector.shape_cast %34 : vector<1x8x16xf32> to vector<8x16xf32>
    %36 = tpu.concatenate %21, %23, %25, %27, %29, %31, %33, %35 in 1 : vector<8x16xf32>, vector<8x16xf32>, vector<8x16xf32>, vector<8x16xf32>, vector<8x16xf32>, vector<8x16xf32>, vector<8x16xf32>, vector<8x16xf32> -> vector<8x128xf32>
    %c0_15 = arith.constant 0 : index
    %c0_16 = arith.constant 0 : index
    %37 = vector.load %arg7[%c0_15, %c0_16] : memref<8x128xf32, #tpu.memory_space<vmem>>, vector<8x128xf32>
    tpu.vector_store %arg7[%c0_15, %c0_16], %36 {strides = array<i32>} : memref<8x128xf32, #tpu.memory_space<vmem>>, vector<8x128xf32>,
    %38 = vector.extract_strided_slice %19 {offsets = [0, 0, 0], sizes = [1, 8, 8], strides = [1, 1, 1]} : vector<8x8x8xf32> to vector<1x8x8xf32>
    %39 = vector.shape_cast %38 : vector<1x8x8xf32> to vector<8x8xf32>
    %40 = vector.extract_strided_slice %19 {offsets = [1, 0, 0], sizes = [1, 8, 8], strides = [1, 1, 1]} : vector<8x8x8xf32> to vector<1x8x8xf32>
    %41 = vector.shape_cast %40 : vector<1x8x8xf32> to vector<8x8xf32>
    %42 = vector.extract_strided_slice %19 {offsets = [2, 0, 0], sizes = [1, 8, 8], strides = [1, 1, 1]} : vector<8x8x8xf32> to vector<1x8x8xf32>
    %43 = vector.shape_cast %42 : vector<1x8x8xf32> to vector<8x8xf32>
    %44 = vector.extract_strided_slice %19 {offsets = [3, 0, 0], sizes = [1, 8, 8], strides = [1, 1, 1]} : vector<8x8x8xf32> to vector<1x8x8xf32>
    %45 = vector.shape_cast %44 : vector<1x8x8xf32> to vector<8x8xf32>
    %46 = vector.extract_strided_slice %19 {offsets = [4, 0, 0], sizes = [1, 8, 8], strides = [1, 1, 1]} : vector<8x8x8xf32> to vector<1x8x8xf32>
    %47 = vector.shape_cast %46 : vector<1x8x8xf32> to vector<8x8xf32>
    %48 = vector.extract_strided_slice %19 {offsets = [5, 0, 0], sizes = [1, 8, 8], strides = [1, 1, 1]} : vector<8x8x8xf32> to vector<1x8x8xf32>
    %49 = vector.shape_cast %48 : vector<1x8x8xf32> to vector<8x8xf32>
    %50 = vector.extract_strided_slice %19 {offsets = [6, 0, 0], sizes = [1, 8, 8], strides = [1, 1, 1]} : vector<8x8x8xf32> to vector<1x8x8xf32>
    %51 = vector.shape_cast %50 : vector<1x8x8xf32> to vector<8x8xf32>
    %52 = vector.extract_strided_slice %19 {offsets = [7, 0, 0], sizes = [1, 8, 8], strides = [1, 1, 1]} : vector<8x8x8xf32> to vector<1x8x8xf32>
    %53 = vector.shape_cast %52 : vector<1x8x8xf32> to vector<8x8xf32>
    %54 = tpu.concatenate %39, %41, %43, %45, %47, %49, %51, %53 in 1 : vector<8x8xf32>, vector<8x8xf32>, vector<8x8xf32>, vector<8x8xf32>, vector<8x8xf32>, vector<8x8xf32>, vector<8x8xf32>, vector<8x8xf32> -> vector<8x64xf32>
    %c0_17 = arith.constant 0 : index
    %c0_18 = arith.constant 0 : index
    %55 = vector.load %arg6[%c0_17, %c0_18] : memref<8x64xf32, #tpu.memory_space<vmem>>, vector<8x64xf32>
    tpu.vector_store %arg6[%c0_17, %c0_18], %54 {strides = array<i32>} : memref<8x64xf32, #tpu.memory_space<vmem>>, vector<8x64xf32>,
    return
  }
  func.func @transform_0(%arg0: i32) -> i32 {
    %c0_i32 = arith.constant 0 : i32
    %c0_i32_0 = arith.constant 0 : i32
    return %c0_i32 : i32
  }
  func.func @transform_1(%arg0: i32) -> (i32, i32, i32) {
    %c0_i32 = arith.constant 0 : i32
    %c0_i32_0 = arith.constant 0 : i32
    %c0_i32_1 = arith.constant 0 : i32
    return %c0_i32, %arg0, %c0_i32_0 : i32, i32, i32
  }
  func.func @transform_2(%arg0: i32) -> (i32, i32, i32) {
    %c0_i32 = arith.constant 0 : i32
    %c0_i32_0 = arith.constant 0 : i32
    %c0_i32_1 = arith.constant 0 : i32
    %c0_i32_2 = arith.constant 0 : i32
    return %c0_i32, %c0_i32_0, %c0_i32_1 : i32, i32, i32
  }
  func.func @transform_3(%arg0: i32) -> (i32, i32, i32) {
    %c0_i32 = arith.constant 0 : i32
    %c0_i32_0 = arith.constant 0 : i32
    %c0_i32_1 = arith.constant 0 : i32
    %c0_i32_2 = arith.constant 0 : i32
    return %c0_i32, %c0_i32_0, %c0_i32_1 : i32, i32, i32
  }
  func.func @transform_4(%arg0: i32) -> (i32, i32, i32) {
    %c0_i32 = arith.constant 0 : i32
    %c0_i32_0 = arith.constant 0 : i32
    %c0_i32_1 = arith.constant 0 : i32
    return %c0_i32, %arg0, %c0_i32_0 : i32, i32, i32
  }
  func.func @transform_5(%arg0: i32) -> (i32, i32) {
    %c0_i32 = arith.constant 0 : i32
    %c0_i32_0 = arith.constant 0 : i32
    return %arg0, %c0_i32 : i32, i32
  }
  func.func @transform_6(%arg0: i32) -> (i32, i32) {
    %c0_i32 = arith.constant 0 : i32
    %c0_i32_0 = arith.constant 0 : i32
    return %arg0, %c0_i32 : i32, i32
  }
}

</mosaic_0001>

<bundles_post_ra>
// kernel: tpu_custom_call.1
= control target key start
LH: loop header
LB: loop body
LE: loop exit
PB: predicated region body
PF: predicated region fallthrough
CT: control target
= control target key end

     0   :  { %s2761_s0 = inlined_call_operand.<no memory space> [shape: f32[1], index: 0, kind: input, shape index: {}]   ;;  %s2762_s1 = inlined_call_operand.vmem [shape: f32[8,16,8], index: 1, kind: input, shape index: {}]   ;;  %s2763_s2 = inlined_call_operand.vmem [shape: f32[8,8,16], index: 2, kind: input, shape index: {}]   ;;  %s2764_s3 = inlined_call_operand.vmem [shape: f32[8,16,8], index: 3, kind: input, shape index: {}]   ;;  %s2765_s4 = inlined_call_operand.vmem [shape: f32[8,16,16], index: 4, kind: input, shape index: {}]   ;;  %s2766_s5 = inlined_call_operand.hbm [shape: f32[16,64], index: 5, kind: output, shape index: {0}]   ;;  %s2767_s6 = inlined_call_operand.hbm [shape: f32[16,128], index: 6, kind: output, shape index: {1}]  }
   0x1   :  { %12 = sst [smem:[#allocation2]] %s2761_s0 }
   0x2   :  { %13 = vsyncpa [#allocation6], 0 }
   0x3   :  { %15 = vsyncpa [#allocation6 + $0x1], 0 }
   0x4   :  { %16 = vsyncpa [#allocation8], 0 }
   0x5   :  { %18 = vsyncpa [#allocation8 + $0x1], 0  ;;  %s2377_s23 = smov 0   ;;  %s2379_s24 = smov 0  }
   0x6   :  { %s2381_s25 = smov 0   ;;  %s2383_s26 = smov 0  }
   0x7 LB: > { %s1942_s0 = sadd.s32 4294967295, %s2321_s26   ;;  %s1943_s27 = sadd.s32 4294967294, %s2321_s26   ;;  %s2321_s26 = sphi %s2383_s26, %s2774_s26   ;;  %s2317_s25 = sphi %s2381_s25, %s2773_s25   ;;  %s2313_s24 = sphi %s2379_s24, %s2772_s24   ;;  %s2309_s23 = sphi %s2377_s23, %s2771_s23  }
   0x8   : > { %s2400_s28 = sadd.s32 1, %s2321_s26   ;;  %s52_s29 = sadd.s32 1, %s2317_s25 }
   0x9   : > { %s49_s30 = ssub.s32 %s2321_s26, %s2400_s28  ;;  %p59_p0 = scmp.ne.s32.totalorder %s2317_s25, %s2313_s24 }
   0xa   : > { %p50_p1 = scmp.eq.s32.totalorder %s49_s30, 0  ;;  %p60_p2 = scmp.eq.s32.totalorder %s2321_s26, 0 }
   0xb   : > { %p157_p3 = scmp.eq.s32.totalorder %s1942_s0, 1  ;;  %p162_p4 = scmp.ne.s32.totalorder %s2313_s24, %s2309_s23 }
   0xc   : > { %s2413_s7 = scalar_select %p50_p1, %s2317_s25, %s52_s29  }
   0xd   : > { %p2415_p5 = por %p60_p2, %p59_p0  ;;  %p2419_p6 = por %p157_p3, %p59_p0 }
   0xe   : > { %p163_p7 = scmp.eq.s32.totalorder %s1943_s27, 1  ;;  %p1945_p9 = scmp.ge.s32.totalorder %s2321_s26, 2 }
  0x10   : > { %p2423_p8 = por %p163_p7, %p162_p4  ;;  %214 = sbr.rel (%p1945_p9) target bundleno = 39 (0x27), region = 28 }
  0x17   : > { %217 = sbr.rel (!%p2415_p5) target bundleno = 31 (0x1f), region = 32  ;;  %s219_s11 = sand.u32 (%p2415_p5), 1, %s2317_s25  }
  0x18   : > { %s1947_s12 = sshll.u32 (%p2415_p5), %s2321_s26, 3  ;;  %s1946_s13 = sshll.u32 (%p2415_p5), %s219_s11, 6 }
  0x19   : > { %s223_s16 = scalar_lea.vmem (%p2415_p5), %s2762_s1, %s1947_s12  ;;  %s221_s17 = scalar_lea.vmem (%p2415_p5), [#allocation3], %s1946_s13 }
  0x1a   : > { %v265_v0 = vld [vmem:[%s223_s16] sm:$0xff] (%p2415_p5)  ;;  %v267_v1 = vld [vmem:[%s223_s16 + $0x10] sm:$0xff] (%p2415_p5) }
  0x1b   : > { %v269_v2 = vld [vmem:[%s223_s16 + $0x20] sm:$0xff] (%p2415_p5)  ;;  %266 = vst [vmem:[%s221_s17] sm:$0xff] (%p2415_p5), %v265_v0  ;;  %268 = vst [vmem:[%s221_s17 + $0x8] sm:$0xff] (%p2415_p5), %v267_v1  ;;  %v271_v3 = vld [vmem:[%s223_s16 + $0x30] sm:$0xff] (%p2415_p5) }
  0x1c   : > { %270 = vst [vmem:[%s221_s17 + $0x10] sm:$0xff] (%p2415_p5), %v269_v2  ;;  %v273_v4 = vld [vmem:[%s223_s16 + $0x40] sm:$0xff] (%p2415_p5)  ;;  %v275_v5 = vld [vmem:[%s223_s16 + $0x50] sm:$0xff] (%p2415_p5)  ;;  %272 = vst [vmem:[%s221_s17 + $0x18] sm:$0xff] (%p2415_p5), %v271_v3 }
  0x1d   : > { %274 = vst [vmem:[%s221_s17 + $0x20] sm:$0xff] (%p2415_p5), %v273_v4  ;;  %276 = vst [vmem:[%s221_s17 + $0x28] sm:$0xff] (%p2415_p5), %v275_v5  ;;  %v277_v6 = vld [vmem:[%s223_s16 + $0x60] sm:$0xff] (%p2415_p5)  ;;  %v279_v7 = vld [vmem:[%s223_s16 + $0x70] sm:$0xff] (%p2415_p5) }
  0x1e   : > { %278 = vst [vmem:[%s221_s17 + $0x30] sm:$0xff] %v277_v6  ;;  %280 = vst [vmem:[%s221_s17 + $0x38] sm:$0xff] %v279_v7 }
  0x1f PF: > { %286 = sbr.rel (!%p2415_p5) target bundleno = 39 (0x27), region = 70  ;;  %s288_s18 = sand.u32 (%p2415_p5), 1, %s2317_s25  }
  0x20   : > { %s1949_s19 = sshll.u32 (%p2415_p5), %s2321_s26, 3  ;;  %s1948_s20 = sshll.u32 (%p2415_p5), %s288_s18, 6 }
  0x21   : > { %s292_s27 = scalar_lea.vmem (%p2415_p5), %s2765_s4, %s1949_s19  ;;  %s290_s29 = scalar_lea.vmem (%p2415_p5), [#allocation4], %s1948_s20 }
  0x22   : > { %v334_v8 = vld [vmem:[%s292_s27] sm:$0xff] (%p2415_p5)  ;;  %v336_v9 = vld [vmem:[%s292_s27 + $0x10] sm:$0xff] (%p2415_p5) }
  0x23   : > { %v338_v10 = vld [vmem:[%s292_s27 + $0x20] sm:$0xff] (%p2415_p5)  ;;  %335 = vst [vmem:[%s290_s29] sm:$0xff] (%p2415_p5), %v334_v8  ;;  %337 = vst [vmem:[%s290_s29 + $0x8] sm:$0xff] (%p2415_p5), %v336_v9  ;;  %v340_v11 = vld [vmem:[%s292_s27 + $0x30] sm:$0xff] (%p2415_p5) }
  0x24   : > { %339 = vst [vmem:[%s290_s29 + $0x10] sm:$0xff] (%p2415_p5), %v338_v10  ;;  %v342_v12 = vld [vmem:[%s292_s27 + $0x40] sm:$0xff] (%p2415_p5)  ;;  %v344_v13 = vld [vmem:[%s292_s27 + $0x50] sm:$0xff] (%p2415_p5)  ;;  %341 = vst [vmem:[%s290_s29 + $0x18] sm:$0xff] (%p2415_p5), %v340_v11 }
  0x25   : > { %343 = vst [vmem:[%s290_s29 + $0x20] sm:$0xff] (%p2415_p5), %v342_v12  ;;  %345 = vst [vmem:[%s290_s29 + $0x28] sm:$0xff] (%p2415_p5), %v344_v13  ;;  %v346_v14 = vld [vmem:[%s292_s27 + $0x60] sm:$0xff] (%p2415_p5)  ;;  %v348_v15 = vld [vmem:[%s292_s27 + $0x70] sm:$0xff] (%p2415_p5) }
  0x26   : > { %347 = vst [vmem:[%s290_s29 + $0x30] sm:$0xff] %v346_v14  ;;  %349 = vst [vmem:[%s290_s29 + $0x38] sm:$0xff] %v348_v15 }
  0x27 PF: > { %p1950_p10 = scmp.ge.s32.totalorder %s2321_s26, 1  ;;  %p354_p11 = scmp.lt.s32.totalorder %s2321_s26, 3 }
  0x29   : > { %p355_p12 = pnand %p1950_p10, %p354_p11 }
  0x2a   : > { %v424_v16 = vld [vmem:[%s2763_s2] sm:$0xff] (!%p355_p12)  ;;  %s2450_s11 = sand.u32 (!%p355_p12), 1, %s2313_s24   ;;  %s406_s12 = sld [smem:[#allocation2]] (!%p355_p12)  ;;  %v2323_v17 = vmov (!%p355_p12), 0.0   ;;  %vm2324_vm0 = vmmov (!%p355_p12), 0   ;;  %v425_v18 = vld [vmem:[%s2763_s2 + $0x8] sm:$0xff] (!%p355_p12) }
  0x2b   : > { %358 = sbr.rel (%p355_p12) target bundleno = 962 (0x3c2), region = 108  ;;  %2017 = vmatprep.subr.mxu0 (!%p355_p12), %v2323_v17  ;;  %2019 = vmatprep.mubr.msk.f32.mxu0 (!%p355_p12), %vm2324_vm0, %v2323_v17  ;;  %s1951_s13 = sshll.u32 (!%p355_p12), %s2450_s11, 6  ;;  %vm456_vm1 = vcmask (!%p355_p12), 64512   ;;  %v426_v26 = vld [vmem:[%s2763_s2 + $0x10] sm:$0xff] (!%p355_p12)  ;;  %v427_v27 = vld [vmem:[%s2763_s2 + $0x18] sm:$0xff] (!%p355_p12)  ;;  %v428_v32 = vld [vmem:[%s2763_s2 + $0x20] sm:$0xff] (!%p355_p12) }
  0x2c   : > { %2018 = vmatpush3.msra.mxu0 (!%p355_p12), %v424_v16  ;;  %2022 = vmatprep.subr.mxu1 (!%p355_p12), %v2323_v17  ;;  %s2464_s16 = scalar_lea.vmem (!%p355_p12), [#allocation3], %s1951_s13  ;;  %v429_v33 = vld [vmem:[%s2763_s2 + $0x28] sm:$0xff] (!%p355_p12)  ;;  %v430_v38 = vld [vmem:[%s2763_s2 + $0x30] sm:$0xff] (!%p355_p12)  ;;  %v431_v39 = vld [vmem:[%s2763_s2 + $0x38] sm:$0xff] (!%p355_p12)  ;;  %s2524_s15 = scalar_lea.vmem (!%p355_p12), [#allocation4], %s1951_s13  ;;  %vm1049_vm2 = vcmask (!%p355_p12), 130048  }
  0x2d   : > { %2023 = vmatpush3.msra.mxu1 (!%p355_p12), %v425_v18  ;;  %2024 = vmatprep.mubr.msk.f32.mxu1 (!%p355_p12), %vm2324_vm0, %v2323_v17  ;;  %v407_v19 = vld [vmem:[%s2464_s16] sm:$0xff] (!%p355_p12)  ;;  %v408_v20 = vld [vmem:[%s2464_s16 + $0x8] sm:$0xff] (!%p355_p12)  ;;  %v409_v22 = vld [vmem:[%s2464_s16 + $0x10] sm:$0xff] (!%p355_p12)  ;;  %s2326_s29 = smov (!%p355_p12), 16   ;;  %s2328_s19 = smov (!%p355_p12), 48   ;;  %vm1744_vm3 = vcmask (!%p355_p12), 261120  }
  0x2e   : > { %2027 = vmatprep.subr.mxu0 (!%p355_p12), %v2323_v17  ;;  %2032 = vmatprep.subr.mxu1 (!%p355_p12), %v2323_v17  ;;  %v410_v23 = vld [vmem:[%s2464_s16 + $0x18] sm:$0xff] (!%p355_p12)  ;;  %v411_v30 = vld [vmem:[%s2464_s16 + $0x20] sm:$0xff] (!%p355_p12)  ;;  %v412_v31 = vld [vmem:[%s2464_s16 + $0x28] sm:$0xff] (!%p355_p12)  ;;  %s2329_s20 = smov (!%p355_p12), 64   ;;  %s2330_s21 = smov (!%p355_p12), 80   ;;  %vm1746_vm4 = vcmask (!%p355_p12), 392192  }
  0x2f   : > { %v413_v36 = vld [vmem:[%s2464_s16 + $0x30] sm:$0xff] (!%p355_p12)  ;;  %v414_v37 = vld [vmem:[%s2464_s16 + $0x38] sm:$0xff] (!%p355_p12)  ;;  %v448_v42 = vld [vmem:[%s2524_s15] sm:$0xff] (!%p355_p12)  ;;  %s2331_s22 = smov (!%p355_p12), 96   ;;  %s2332_s27 = smov (!%p355_p12), 112   ;;  %vm1748_vm5 = vcmask (!%p355_p12), 523264  }
  0x30   : > { %v415_v21 = vstv (!%p355_p12), %s406_s12  ;;  %v449_v43 = vld [vmem:[%s2524_s15 + $0x8] sm:$0xff] (!%p355_p12)  ;;  %v450_v50 = vld [vmem:[%s2524_s15 + $0x10] sm:$0xff] (!%p355_p12)  ;;  %v451_v51 = vld [vmem:[%s2524_s15 + $0x18] sm:$0xff] (!%p355_p12)  ;;  %vm1750_vm6 = vcmask (!%p355_p12), 654336   ;;  %s1953_s30 = sshll.u32 (!%p355_p12), %s2450_s11, 3  ;;  %vm1752_vm7 = vcmask (!%p355_p12), 785408  }
  0x31   : > { %v416_v24 = vmul.f32 (!%p355_p12), %v415_v21, %v407_v19  ;;  %v417_v25 = vmul.f32 (!%p355_p12), %v415_v21, %v408_v20  ;;  %v418_v28 = vmul.f32 (!%p355_p12), %v415_v21, %v409_v22  ;;  %v419_v29 = vmul.f32 (!%p355_p12), %v415_v21, %v410_v23  ;;  %v452_v60 = vld [vmem:[%s2524_s15 + $0x20] sm:$0xff] (!%p355_p12)  ;;  %v453_v61 = vld [vmem:[%s2524_s15 + $0x28] sm:$0xff] (!%p355_p12)  ;;  %v454_v6 = vld [vmem:[%s2524_s15 + $0x30] sm:$0xff] (!%p355_p12)  ;;  %s2668_s8 = scalar_lea.vmem (!%p355_p12), [#allocation7], %s1953_s30  ;;  %s2333_s12 = smov (!%p355_p12), 8  }
  0x32   : > { %v420_v34 = vmul.f32 %v415_v21, %v411_v30  ;;  %v421_v35 = vmul.f32 %v415_v21, %v412_v31  ;;  %v422_v40 = vmul.f32 %v415_v21, %v413_v36  ;;  %v423_v41 = vmul.f32 %v415_v21, %v414_v37  ;;  %v455_v7 = vld [vmem:[%s2524_s15 + $0x38] sm:$0xff]  ;;  %s2327_s15 = smov 32   ;;  %s2334_s14 = smov 24  }
  0x33   : > { %2020 = vmatmul.mubr.msk.f32.vlgmr.msra.gmra.mrb[0].mxu0 %vm456_vm1, %v416_v24  ;;  %2025 = vmatmul.mubr.msk.f32.vlgmr.msra.gmra.mrb[0].mxu1 %vm456_vm1, %v417_v25  ;;  %vm1754_vm8 = vcmask 916480   ;;  %s2677_s13 = sshll.u32 %s1942_s0, 7  ;;  %s1828_s18 = sshll.u32 %s2668_s8, 4  ;;  %s1829_s18 = int_to_ptr.vmem [resolvable:$true] %s1828_s18 }
  0x34   : > { %2028 = vmatpush3.msra.mxu0 %v426_v26  ;;  %2029 = vmatprep.mubr.msk.f32.mxu0 %vm2324_vm0, %v2323_v17  ;;  %s2683_s17 = scalar_lea.hbm %s2767_s6, %s2677_s13 }
  0x35   : > { %2037 = vmatprep.subr.mxu0 %v2323_v17  ;;  %2033 = vmatpush3.msra.mxu1 %v427_v27 }
  0x36   : > { %2034 = vmatprep.mubr.msk.f32.mxu1 %vm2324_vm0, %v2323_v17  ;;  %2042 = vmatprep.subr.mxu1 %v2323_v17 }
  0x37   : > { %2030 = vmatmul.mubr.msk.f32.vlgmr.msra.gmra.mrb[2].mxu0 %vm456_vm1, %v418_v28  ;;  %2035 = vmatmul.mubr.msk.f32.vlgmr.msra.gmra.mrb[2].mxu1 %vm456_vm1, %v419_v29 }
  0x38   : > { %2038 = vmatpush3.msra.mxu0 %v428_v32  ;;  %2039 = vmatprep.mubr.msk.f32.mxu0 %vm2324_vm0, %v2323_v17 }
  0x39   : > { %2047 = vmatprep.subr.mxu0 %v2323_v17  ;;  %2043 = vmatpush3.msra.mxu1 %v429_v33 }
  0x3a   : > { %2044 = vmatprep.mubr.msk.f32.mxu1 %vm2324_vm0, %v2323_v17  ;;  %2052 = vmatprep.subr.mxu1 %v2323_v17 }
  0x3b   : > { %2040 = vmatmul.mubr.msk.f32.vlgmr.msra.gmra.mrb[4].mxu0 %vm456_vm1, %v420_v34  ;;  %2045 = vmatmul.mubr.msk.f32.vlgmr.msra.gmra.mrb[4].mxu1 %vm456_vm1, %v421_v35 }
  0x3c   : > { %2048 = vmatpush3.msra.mxu0 %v430_v38  ;;  %2049 = vmatprep.mubr.msk.f32.mxu0 %vm2324_vm0, %v2323_v17 }
  0x3d   : > { %2053 = vmatpush3.msra.mxu1 %v431_v39  ;;  %2054 = vmatprep.mubr.msk.f32.mxu1 %vm2324_vm0, %v2323_v17 }
  0x3f   : > { %2050 = vmatmul.mubr.msk.f32.vlgmr.msra.gmra.mrb[6].mxu0 %vm456_vm1, %v422_v40  ;;  %2055 = vmatmul.mubr.msk.f32.vlgmr.msra.gmra.mrb[6].mxu1 %vm456_vm1, %v423_v41 }
  0x40   : > { %2061 = vmatprep.mubr.msk.f32.mxu0 %vm2324_vm0, %v2323_v17  ;;  %2068 = vmatprep.mubr.msk.f32.mxu1 %vm2324_vm0, %v2323_v17 }
 0x106   : > { %v526_v44 = vpop.f32.mrb[0].mxu0  ;;  %v599_v45 = vpop.f32.mrb[0].mxu1 }
 0x107   : > { %v1041_v46 = vmul.f32 %v526_v44, %v448_v42  ;;  %v2021_v47 = vpop.f32.mrb[1].mxu0  ;;  %v1042_v48 = vmul.f32 %v599_v45, %v449_v43  ;;  %v2026_v49 = vpop.f32.mrb[1].mxu1 }
 0x109   : > { %v1050_v52 = vsel %vm1049_vm2, %v1041_v46, -inf  ;;  %v1053_v58 = vsel %vm1049_vm2, %v1042_v48, -inf }
 0x10a   : > { %1051 = vmax.xlane.f32.xlu0 %v1050_v52  ;;  %v672_v53 = vpop.f32.mrb[2].mxu0  ;;  %v745_v54 = vpop.f32.mrb[2].mxu1 }
 0x10b   : > { %v1043_v55 = vmul.f32 %v672_v53, %v450_v50  ;;  %v2031_v56 = vpop.f32.mrb[3].mxu0  ;;  %v1044_v57 = vmul.f32 %v745_v54, %v451_v51  ;;  %v2036_v59 = vpop.f32.mrb[3].mxu1 }
 0x10c   : > { %v432_v59 = vld [vmem:[%s2764_s3] sm:$0xff] }
 0x10d   : > { %v1056_v62 = vsel %vm1049_vm2, %v1043_v55, -inf  ;;  %v1059_v4 = vsel %vm1049_vm2, %v1044_v57, -inf }
 0x10e   : > { %1054 = vmax.xlane.f32.xlu0 %v1053_v58  ;;  %1057 = vmax.xlane.f32.xlu1 %v1056_v62  ;;  %v818_v63 = vpop.f32.mrb[4].mxu0  ;;  %v891_v0 = vpop.f32.mrb[4].mxu1  ;;  %v2325_v62 = vmov 0.0|0.0  }
 0x10f   : > { %v1045_v1 = vmul.f32 %v818_v63, %v452_v60  ;;  %v2041_v2 = vpop.f32.mrb[5].mxu0  ;;  %v1046_v3 = vmul.f32 %v891_v0, %v453_v61  ;;  %v2046_v5 = vpop.f32.mrb[5].mxu1  ;;  %v433_v60 = vld [vmem:[%s2764_s3 + $0x8] sm:$0xff]  ;;  %2113 = vmatprep.subr.bf16.mxu0 %v2325_v62  ;;  %2116 = vmatprep.subr.bf16.mxu1 %v2325_v62  ;;  %v434_v63 = vld [vmem:[%s2764_s3 + $0x10] sm:$0xff]  ;;  %v435_v0 = vld [vmem:[%s2764_s3 + $0x18] sm:$0xff] }
 0x110   : > { %v2114_v61 = vpack.c.bf16 %v433_v60, %v432_v59 }
 0x111   : > { %v1062_v8 = vsel %vm1049_vm2, %v1045_v1, -inf  ;;  %v1065_v13 = vsel %vm1049_vm2, %v1046_v3, -inf }
 0x112   : > { %1060 = vmax.xlane.f32.xlu1 %v1059_v4  ;;  %1063 = vmax.xlane.f32.xlu0 %v1062_v8  ;;  %v964_v9 = vpop.f32.mrb[6].mxu0  ;;  %v1037_v10 = vpop.f32.mrb[6].mxu1 }
 0x113   : > { %v1047_v11 = vmul.f32 %v964_v9, %v454_v6  ;;  %v1048_v12 = vmul.f32 %v1037_v10, %v455_v7  ;;  %v2051_v14 = vpop.f32.mrb[7].mxu0  ;;  %v2056_v15 = vpop.f32.mrb[7].mxu1  ;;  %2115 = vmatpush3.bf16.msra.mxu0 %v2114_v61  ;;  %v436_v6 = vld [vmem:[%s2764_s3 + $0x20] sm:$0xff]  ;;  %v437_v7 = vld [vmem:[%s2764_s3 + $0x28] sm:$0xff] }
 0x114   : > { %2119 = vmatprep.subr.bf16.mxu0 %v2325_v62  ;;  %v2120_v10 = vpack.c.bf16 %v437_v7, %v436_v6  ;;  %v439_v15 = vld [vmem:[%s2764_s3 + $0x38] sm:$0xff] }
 0x115   : > { %v1068_v16 = vsel %vm1049_vm2, %v1047_v11, -inf  ;;  %v1071_v18 = vsel %vm1049_vm2, %v1048_v12, -inf }
 0x116   : > { %1066 = vmax.xlane.f32.xlu1 %v1065_v13  ;;  %1069 = vmax.xlane.f32.xlu0 %v1068_v16  ;;  %v438_v13 = vld [vmem:[%s2764_s3 + $0x30] sm:$0xff]  ;;  %v440_v16 = vld [vmem:[%s2764_s3 + $0x40] sm:$0xff] }
 0x11a   : > { %1072 = vmax.xlane.f32.xlu1 %v1071_v18  ;;  %v441_v18 = vld [vmem:[%s2764_s3 + $0x48] sm:$0xff] }
 0x197   : > { %v1052_v19 = vpop.xlane.xlu0 %1051 }
 0x198   : > { %v1074_v20 = vsub.f32 %v1041_v46, %v1052_v19 }
 0x19a   : > { %v1082_v21 = vmul.f32 1.442695, %v1074_v20 }
 0x19b   : > { %v1055_v22 = vpop.xlane.xlu0 %1054  ;;  %v1058_v23 = vpop.xlane.xlu1 %1057 }
 0x19c   : > { %2195 = vpow2.f32 %v1082_v21  ;;  %v1075_v24 = vsub.f32 %v1042_v48, %v1055_v22  ;;  %v1076_v25 = vsub.f32 %v1043_v55, %v1058_v23  ;;  %v2123_v23 = vpack.c.bf16 %v439_v15, %v438_v13 }
 0x19e   : > { %v1084_v26 = vmul.f32 1.442695, %v1075_v24  ;;  %v1086_v27 = vmul.f32 1.442695, %v1076_v25  ;;  %v2126_v24 = vpack.c.bf16 %v441_v18, %v440_v16 }
 0x19f   : > { %v1061_v28 = vpop.xlane.xlu1 %1060  ;;  %v1064_v29 = vpop.xlane.xlu0 %1063 }
 0x1a0   : > { %2197 = vpow2.f32 %v1084_v26  ;;  %v1077_v30 = vsub.f32 %v1044_v57, %v1061_v28  ;;  %v1078_v31 = vsub.f32 %v1045_v1, %v1064_v29  ;;  %v2117_v1 = vpack.c.bf16 %v435_v0, %v434_v63  ;;  %v442_v26 = vld [vmem:[%s2764_s3 + $0x50] sm:$0xff]  ;;  %v444_v28 = vld [vmem:[%s2764_s3 + $0x60] sm:$0xff]  ;;  %v445_v29 = vld [vmem:[%s2764_s3 + $0x68] sm:$0xff] }
 0x1a1   : > { %2199 = vpow2.f32 %v1086_v27  ;;  %v443_v27 = vld [vmem:[%s2764_s3 + $0x58] sm:$0xff] }
 0x1a2   : > { %v1088_v32 = vmul.f32 1.442695, %v1077_v30  ;;  %v1090_v33 = vmul.f32 1.442695, %v1078_v31  ;;  %2118 = vmatpush3.bf16.msra.mxu1 %v2117_v1 }
 0x1a3   : > { %v1067_v34 = vpop.xlane.xlu1 %1066  ;;  %v1070_v35 = vpop.xlane.xlu0 %1069  ;;  %2122 = vmatprep.subr.bf16.mxu1 %v2325_v62 }
 0x1a4   : > { %2201 = vpow2.f32 %v1088_v32  ;;  %v1079_v36 = vsub.f32 %v1046_v3, %v1067_v34  ;;  %v1080_v37 = vsub.f32 %v1047_v11, %v1070_v35  ;;  %v2132_v35 = vpack.c.bf16 %v445_v29, %v444_v28 }
 0x1a5   : > { %2203 = vpow2.f32 %v1090_v33  ;;  %v2129_v33 = vpack.c.bf16 %v443_v27, %v442_v26 }
 0x1a6   : > { %v2196_v38 = vpop.eup %2195  ;;  %v1092_v39 = vmul.f32 1.442695, %v1079_v36  ;;  %v1094_v40 = vmul.f32 1.442695, %v1080_v37  ;;  %v446_v36 = vld [vmem:[%s2764_s3 + $0x70] sm:$0xff]  ;;  %v447_v37 = vld [vmem:[%s2764_s3 + $0x78] sm:$0xff] }
 0x1a7   : > { %v1073_v41 = vpop.xlane.xlu1 %1072  ;;  %v1098_v42 = vsel %vm1049_vm2, %v2196_v38, 0.0 }
 0x1a8   : > { %2205 = vpow2.f32 %v1092_v39  ;;  %v1081_v43 = vsub.f32 %v1048_v12, %v1073_v41  ;;  %1099 = vadd.xlane.f32.xlu0 %v1098_v42  ;;  %v2135_v41 = vpack.c.bf16 %v447_v37, %v446_v36 }
 0x1a9   : > { %2207 = vpow2.f32 %v1094_v40 }
 0x1aa   : > { %v2543_v44 = vpop.eup %2197  ;;  %v1096_v45 = vmul.f32 1.442695, %v1081_v43 }
 0x1ab   : > { %v2545_v46 = vpop.eup %2199  ;;  %v1101_v47 = vsel %vm1049_vm2, %v2543_v44, 0.0 }
 0x1ac   : > { %2209 = vpow2.f32 %v1096_v45  ;;  %1102 = vadd.xlane.f32.xlu1 %v1101_v47  ;;  %v1104_v48 = vsel %vm1049_vm2, %v2545_v46, 0.0 }
 0x1ad   : > { %1105 = vadd.xlane.f32.xlu0 %v1104_v48 }
 0x1ae   : > { %v2551_v49 = vpop.eup %2201 }
 0x1af   : > { %v2553_v50 = vpop.eup %2203  ;;  %v1107_v51 = vsel %vm1049_vm2, %v2551_v49, 0.0 }
 0x1b0   : > { %1108 = vadd.xlane.f32.xlu1 %v1107_v51  ;;  %v1110_v52 = vsel %vm1049_vm2, %v2553_v50, 0.0 }
 0x1b1   : > { %1111 = vadd.xlane.f32.xlu0 %v1110_v52 }
 0x1b2   : > { %v2559_v53 = vpop.eup %2205 }
 0x1b3   : > { %v2561_v54 = vpop.eup %2207  ;;  %v1113_v55 = vsel %vm1049_vm2, %v2559_v53, 0.0 }
 0x1b4   : > { %1114 = vadd.xlane.f32.xlu1 %v1113_v55  ;;  %v1116_v56 = vsel %vm1049_vm2, %v2561_v54, 0.0 }
 0x1b5   : > { %1117 = vadd.xlane.f32.xlu0 %v1116_v56 }
 0x1b6   : > { %v2567_v57 = vpop.eup %2209 }
 0x1b7   : > { %v1119_v58 = vsel %vm1049_vm2, %v2567_v57, 0.0 }
 0x1b8   : > { %1120 = vadd.xlane.f32.xlu1 %v1119_v58 }
 0x235   : > { %v1100_v2 = vpop.xlane.xlu0 %1099 }
 0x236   : > { %2211 = vrcp.f32 %v1100_v2 }
 0x239   : > { %v1103_v3 = vpop.xlane.xlu1 %1102 }
 0x23a   : > { %2213 = vrcp.f32 %v1103_v3  ;;  %v1106_v4 = vpop.xlane.xlu0 %1105 }
 0x23b   : > { %2215 = vrcp.f32 %v1106_v4 }
 0x23d   : > { %v1109_v5 = vpop.xlane.xlu1 %1108 }
 0x23e   : > { %2217 = vrcp.f32 %v1109_v5  ;;  %v1112_v8 = vpop.xlane.xlu0 %1111 }
 0x23f   : > { %2219 = vrcp.f32 %v1112_v8 }
 0x240   : > { %v2212_v9 = vpop.eup %2211 }
 0x241   : > { %v2593_v11 = vmul.f32 %v2212_v9, %v2196_v38  ;;  %v1115_v12 = vpop.xlane.xlu1 %1114 }
 0x242   : > { %2221 = vrcp.f32 %v1115_v12  ;;  %v1118_v14 = vpop.xlane.xlu0 %1117 }
 0x243   : > { %2223 = vrcp.f32 %v1118_v14  ;;  %2062 = vmatmul.mubr.msk.f32.vlgmr.msra.gmra.mrb[8].mxu0 %vm1049_vm2, %v2593_v11 }
 0x244   : > { %v2214_v19 = vpop.eup %2213  ;;  %2121 = vmatpush3.bf16.msra.mxu0 %v2120_v10  ;;  %2075 = vmatprep.mubr.msk.f32.mxu0 %vm2324_vm0, %v2323_v17 }
 0x245   : > { %v2216_v20 = vpop.eup %2215  ;;  %v1131_v21 = vmul.f32 %v2214_v19, %v2543_v44  ;;  %v1121_v22 = vpop.xlane.xlu1 %1120  ;;  %2125 = vmatprep.subr.bf16.mxu0 %v2325_v62 }
 0x246   : > { %2225 = vrcp.f32 %v1121_v22  ;;  %v1132_v25 = vmul.f32 %v2216_v20, %v2545_v46 }
 0x247   : > { %2069 = vmatmul.mubr.msk.f32.vlgmr.msra.gmra.mrb[8].mxu1 %vm1049_vm2, %v1131_v21  ;;  %1722 = vrot.lane.b32.xlu0 %v1131_v21, %s2326_s29 }
 0x248   : > { %v2218_v30 = vpop.eup %2217  ;;  %1725 = vrot.lane.b32.xlu1 %v1132_v25, %s2327_s15  ;;  %2076 = vmatmul.mubr.msk.f32.vlgmr.msra.gmra.mrb[10].mxu0 %vm1049_vm2, %v1132_v25 }
 0x249   : > { %v2220_v31 = vpop.eup %2219  ;;  %v1133_v32 = vmul.f32 %v2218_v30, %v2551_v49  ;;  %2124 = vmatpush3.bf16.msra.mxu1 %v2123_v23  ;;  %2127 = vmatpush3.bf16.msra.mxu0 %v2126_v24 }
 0x24a   : > { %v1134_v34 = vmul.f32 %v2220_v31, %v2553_v50  ;;  %2082 = vmatprep.mubr.msk.f32.mxu1 %vm2324_vm0, %v2323_v17  ;;  %2089 = vmatprep.mubr.msk.f32.mxu0 %vm2324_vm0, %v2323_v17 }
 0x24b   : > { %2128 = vmatprep.subr.bf16.mxu1 %v2325_v62  ;;  %1728 = vrot.lane.b32.xlu0 %v1133_v32, %s2328_s19 }
 0x24c   : > { %v2222_v38 = vpop.eup %2221  ;;  %2083 = vmatmul.mubr.msk.f32.vlgmr.msra.gmra.mrb[10].mxu1 %vm1049_vm2, %v1133_v32  ;;  %2090 = vmatmul.mubr.msk.f32.vlgmr.msra.gmra.mrb[12].mxu0 %vm1049_vm2, %v1134_v34 }
 0x24d   : > { %v2224_v39 = vpop.eup %2223  ;;  %v1135_v40 = vmul.f32 %v2222_v38, %v2559_v53  ;;  %2131 = vmatprep.subr.bf16.mxu0 %v2325_v62  ;;  %2130 = vmatpush3.bf16.msra.mxu1 %v2129_v33 }
 0x24e   : > { %v1136_v42 = vmul.f32 %v2224_v39, %v2561_v54  ;;  %2133 = vmatpush3.bf16.msra.mxu0 %v2132_v35  ;;  %2096 = vmatprep.mubr.msk.f32.mxu1 %vm2324_vm0, %v2323_v17 }
 0x24f   : > { %2103 = vmatprep.mubr.msk.f32.mxu0 %vm2324_vm0, %v2323_v17  ;;  %2134 = vmatprep.subr.bf16.mxu1 %v2325_v62 }
 0x250   : > { %v2226_v43 = vpop.eup %2225  ;;  %2097 = vmatmul.mubr.msk.f32.vlgmr.msra.gmra.mrb[12].mxu1 %vm1049_vm2, %v1135_v40  ;;  %1731 = vrot.lane.b32.xlu0 %v1134_v34, %s2329_s20  ;;  %s2335_s20 = smov 40  }
 0x251   : > { %v1137_v44 = vmul.f32 %v2226_v43, %v2567_v57  ;;  %2104 = vmatmul.mubr.msk.f32.vlgmr.msra.gmra.mrb[14].mxu0 %vm1049_vm2, %v1136_v42  ;;  %2136 = vmatpush3.bf16.msra.mxu1 %v2135_v41 }
 0x252   : > { %2110 = vmatprep.mubr.msk.f32.mxu1 %vm2324_vm0, %v2323_v17 }
 0x254   : > { %2111 = vmatmul.mubr.msk.f32.vlgmr.msra.gmra.mrb[14].mxu1 %vm1049_vm2, %v1137_v44  ;;  %1734 = vrot.lane.b32.xlu0 %v1135_v40, %s2330_s21  ;;  %s1802_s21 = scalar_lea.sflag [#allocation8], %s2450_s11 }
 0x258   : > { %1737 = vrot.lane.b32.xlu0 %v1136_v42, %s2331_s22  ;;  %s2227_s22 = scalar_lea.vmem %s1829_s18, 128 }
 0x259   : > { %p2228_p13 = scmp.ne.s32.totalorder %s1829_s18, %s2227_s22 }
 0x25b   : > { %p2229_p0 = pnand %p2228_p13, %p2419_p6 }
 0x25c   : > { %1740 = vrot.lane.b32.xlu0 %v1137_v44, %s2332_s27 }
 0x25d   : > { %p2230_p1 = pneg %p2229_p0 }
 0x2b9   : > { %v1723_v45 = vpop.permute.xlu0 %1722 }
 0x2ba   : > { %v1726_v49 = vpop.permute.xlu1 %1725  ;;  %v1743_v50 = vsel %vm1049_vm2, %v2593_v11, %v1723_v45 }
 0x2bb   : > { %v1745_v17 = vsel %vm1744_vm3, %v1743_v50, %v1726_v49 }
 0x2bd   : > { %v1729_v46 = vpop.permute.xlu0 %1728 }
 0x2be   : > { %v1747_v52 = vsel %vm1746_vm4, %v1745_v17, %v1729_v46 }
 0x2c2   : > { %v1732_v47 = vpop.permute.xlu0 %1731 }
 0x2c3   : > { %v1749_v53 = vsel %vm1748_vm5, %v1747_v52, %v1732_v47 }
 0x2c6   : > { %v1735_v48 = vpop.permute.xlu0 %1734 }
 0x2c7   : > { %v1751_v54 = vsel %vm1750_vm6, %v1749_v53, %v1735_v48 }
 0x2ca   : > { %v1738_v51 = vpop.permute.xlu0 %1737 }
 0x2cb   : > { %v1753_v55 = vsel %vm1752_vm7, %v1751_v54, %v1738_v51 }
 0x2ce   : > { %v1741_v56 = vpop.permute.xlu0 %1740 }
 0x2cf   : > { %v1755_v57 = vsel %vm1754_vm8, %v1753_v55, %v1741_v56 }
 0x2d0   : > { %1756 = vst [vmem:[%s2668_s8] sm:$0xff] %v1755_v57 }
 0x316   : > { %v2671_v58 = vpop.f32.mrb[8].mxu0 }
 0x317   : > { %v2063_v59 = vpop.f32.mrb[9].mxu0 }
 0x31a   : > { %v1280_v60 = vpop.f32.mrb[8].mxu1 }
 0x31b   : > { %v1353_v61 = vpop.f32.mrb[10].mxu0  ;;  %v2070_v62 = vpop.f32.mrb[9].mxu1  ;;  %1758 = vrot.lane.b32.xlu1 %v1280_v60, %s2333_s12 }
 0x31c   : > { %v2077_v63 = vpop.f32.mrb[11].mxu0 }
 0x31f   : > { %v1426_v0 = vpop.f32.mrb[10].mxu1  ;;  %v1499_v1 = vpop.f32.mrb[12].mxu0  ;;  %1762 = vrot.lane.b32.xlu1 %v1353_v61, %s2326_s29 }
 0x320   : > { %v2084_v2 = vpop.f32.mrb[11].mxu1  ;;  %v2091_v3 = vpop.f32.mrb[13].mxu0 }
 0x323   : > { %v1572_v4 = vpop.f32.mrb[12].mxu1  ;;  %1766 = vrot.lane.b32.xlu1 %v1426_v0, %s2334_s14 }
 0x324   : > { %v1645_v5 = vpop.f32.mrb[14].mxu0  ;;  %v2098_v6 = vpop.f32.mrb[13].mxu1 }
 0x325   : > { %v2105_v7 = vpop.f32.mrb[15].mxu0 }
 0x327   : > { %v1718_v8 = vpop.f32.mrb[14].mxu1  ;;  %1770 = vrot.lane.b32.xlu1 %v1499_v1, %s2327_s15  ;;  %s2336_s15 = smov [#allocation7]  }
 0x328   : > { %v2112_v9 = vpop.f32.mrb[15].mxu1  ;;  %s2231_s0 = sshll.u32 %s2336_s15, 4  ;;  %s2232_s0 = int_to_ptr.vmem [resolvable:$false] %s2231_s0 }
 0x329   : > { %s2233_s27 = scalar_lea.vmem %s2232_s0, 256  ;;  %p2234_p2 = scmp.lt.s32.totalorder %s1829_s18, %s2232_s0 }
 0x32a   : > { %p2235_p3 = scmp.lt.s32.totalorder %s2233_s27, %s2227_s22 }
 0x32b   : > { %1774 = vrot.lane.b32.xlu1 %v1572_v4, %s2335_s20 }
 0x32c   : > { %p2236_p4 = por %p2235_p3, %p2234_p2 }
 0x32e   : > { %p2237_p5 = pnand %p2236_p4, %p2230_p1 }
 0x330   : > { %2240 = shalt.err (!%p2237_p5)
}
 0x331   : > { %s2241_s8 = scalar_lea.hbm %s2683_s17, 128  ;;  %s2245_s16 = scalar_lea.hbm %s2767_s6, 256 }
 0x332   : > { %p2242_p7 = scmp.ne.s32.totalorder %s2683_s17, %s2241_s8  ;;  %p2246_p12 = scmp.lt.u32.totalorder %s2683_s17, %s2767_s6 }
 0x333   : > { %p2247_p13 = scmp.lt.u32.totalorder %s2245_s16, %s2241_s8  ;;  %p2249_p1 = scmp.lt.u32.totalorder %s2241_s8, %s2683_s17 }
 0x334   : > { %p2243_p10 = pnand %p2242_p7, %p2419_p6 }
 0x335   : > { %p2248_p0 = por %p2247_p13, %p2246_p12 }
 0x336   : > { %p2244_p11 = pneg %p2243_p10 }
 0x337   : > { %p2250_p2 = por %p2249_p1, %p2248_p0 }
 0x339   : > { %p2251_p3 = pnand %p2250_p2, %p2244_p11 }
 0x33b   : > { %2254 = shalt.err (!%p2251_p3)
}
 0x33c   : > { %2138 = dma.vmem_to_hbm [thread:$0]  (%p2419_p6), %s1829_s18, 128, %s2683_s17, %s1802_s21   ;;  %1778 = vrot.lane.b32.xlu1 %v1645_v5, %s2328_s19  ;;  %vm1787_vm9 = vcmask 195584   ;;  %vm1790_vm10 = vcmask 326656   ;;  %vm1793_vm11 = vcmask 457728  }
 0x33d   : > { %s2337_s22 = smov 56   ;;  %s398_s19 = scalar_lea.vmem [#allocation5], %s1953_s30 }
 0x33e   : > { %s1815_s17 = sshll.u32 %s398_s19, 4  ;;  %s2716_s15 = scalar_lea.hbm %s2766_s5, %s2677_s13  ;;  %s2718_s17 = int_to_ptr.vmem [resolvable:$true] %s1815_s17 }
 0x33f   : > { %s1797_s30 = scalar_lea.sflag [#allocation6], %s2450_s11  ;;  %s2255_s0 = scalar_lea.vmem %s2718_s17, 128 }
 0x340   : > { %1782 = vrot.lane.b32.xlu1 %v1718_v8, %s2337_s22  ;;  %p2256_p4 = scmp.ne.s32.totalorder %s2718_s17, %s2255_s0  ;;  %s2338_s27 = smov [#allocation5]  }
 0x341   : > { %s2259_s8 = sshll.u32 %s2338_s27, 4  ;;  %s2260_s8 = int_to_ptr.vmem [resolvable:$false] %s2259_s8 }
 0x342   : > { %p2257_p5 = pnand %p2256_p4, %p2419_p6  ;;  %s2261_s12 = scalar_lea.vmem %s2260_s8, 256 }
 0x343   : > { %p2262_p10 = scmp.lt.s32.totalorder %s2718_s17, %s2260_s8  ;;  %p2263_p11 = scmp.lt.s32.totalorder %s2261_s12, %s2255_s0 }
 0x344   : > { %p2258_p7 = pneg %p2257_p5 }
 0x345   : > { %p2264_p12 = por %p2263_p11, %p2262_p10 }
 0x347   : > { %p2265_p13 = pnand %p2264_p12, %p2258_p7 }
 0x38d   : > { %v1759_v10 = vpop.permute.xlu1 %1758 }
 0x38e   : > { %v1785_v15 = vsel %vm456_vm1, %v2671_v58, %v1759_v10 }
 0x391   : > { %v1763_v11 = vpop.permute.xlu1 %1762 }
 0x392   : > { %v1786_v16 = vsel %vm1049_vm2, %v1785_v15, %v1763_v11 }
 0x395   : > { %v1767_v12 = vpop.permute.xlu1 %1766 }
 0x396   : > { %v1788_v19 = vsel %vm1787_vm9, %v1786_v16, %v1767_v12 }
 0x399   : > { %v1771_v13 = vpop.permute.xlu1 %1770 }
 0x39a   : > { %v1789_v20 = vsel %vm1744_vm3, %v1788_v19, %v1771_v13 }
 0x39d   : > { %v1775_v14 = vpop.permute.xlu1 %1774 }
 0x39e   : > { %v1791_v21 = vsel %vm1790_vm10, %v1789_v20, %v1775_v14 }
 0x3ae   : > { %v1779_v18 = vpop.permute.xlu1 %1778 }
 0x3af   : > { %v1792_v22 = vsel %vm1746_vm4, %v1791_v21, %v1779_v18 }
 0x3b2   : > { %v1783_v23 = vpop.permute.xlu1 %1782 }
 0x3b3   : > { %v1794_v24 = vsel %vm1793_vm11, %v1792_v22, %v1783_v23 }
 0x3b4   : > { %1795 = vst.msk [vmem:[%s398_s19] sm:$0xff] %vm1748_vm5, %v1794_v24 }
 0x3b5   : > { %2268 = shalt.err (!%p2265_p13)
}
 0x3b6   : > { %s2269_s11 = scalar_lea.hbm %s2716_s15, 128  ;;  %s2273_s16 = scalar_lea.hbm %s2766_s5, 256 }
 0x3b7   : > { %p2270_p0 = scmp.ne.s32.totalorder %s2716_s15, %s2269_s11  ;;  %p2274_p3 = scmp.lt.u32.totalorder %s2716_s15, %s2766_s5 }
 0x3b8   : > { %p2275_p4 = scmp.lt.u32.totalorder %s2273_s16, %s2269_s11  ;;  %p2277_p7 = scmp.lt.u32.totalorder %s2269_s11, %s2716_s15 }
 0x3b9   : > { %p2271_p1 = pnand %p2270_p0, %p2419_p6 }
 0x3ba   : > { %p2276_p5 = por %p2275_p4, %p2274_p3 }
 0x3bb   : > { %p2272_p2 = pneg %p2271_p1 }
 0x3bc   : > { %p2278_p10 = por %p2277_p7, %p2276_p5 }
 0x3be   : > { %p2279_p11 = pnand %p2278_p10, %p2272_p2 }
 0x3c0   : > { %2282 = shalt.err (!%p2279_p11)
}
 0x3c1   : > { %2137 = dma.vmem_to_hbm [thread:$0]  (%p2419_p6), %s2718_s17, 128, %s2716_s15, %s1797_s30  }
 0x3c2 PF: > { %s1840_s22 = sand.u32 1, %s2309_s23   ;;  %p2142_p12 = pnand %p1945_p9, %p2423_p8 }
 0x3c3   : > { %s1841_s19 = scalar_lea.sflag [#allocation6], %s1840_s22 }
 0x3c4   : > { %2300 = dma.done.wait (!%p2142_p12), %s1841_s19, 128  }
 0x3c5   : > { %2302 = vsyncadd (!%p2142_p12), %s1841_s19, 4294967168  ;;  %s1850_s18 = scalar_lea.sflag [#allocation8], %s1840_s22 }
 0x3c6   : > { %2304 = dma.done.wait (!%p2142_p12), %s1850_s18, 128  }
 0x3c7   : > { %2306 = vsyncadd (!%p2142_p12), %s1850_s18, 4294967168  ;;  %p21_p6 = scmp.ge.s32.totalorder %s2400_s28, 4   ;;  %s2771_s23 = smov %s2313_s24 }
 0x3c8   : > { %s2772_s24 = smov %s2317_s25  ;;  %s2773_s25 = smov %s2413_s7 }
 0x3c9   : > { %s2774_s26 = smov %s2400_s28  ;;  %23 = sbr.rel (!%p21_p6) target bundleno = 7 (0x7), region = 181 }
 0x3d0   :  { %1855 = vsyncpa [#allocation6], 1 }
 0x3d1   :  { %1857 = vsyncpa [#allocation6 + $0x1], 1 }
 0x3d2   :  { %1858 = vsyncpa [#allocation8], 1 }
 0x3d3   :  { %1860 = vsyncpa [#allocation8 + $0x1], 1 }

</bundles_post_ra>
